<compile_context>
chip_gen: v7x
topology: tpu7x:2x2x1
jax: 0.10.0
libtpu: 0.0.40
codegen_flags: <defaults>
</compile_context>

<pallas_src>
import jax
import jax.numpy as jnp
from jax.experimental import pallas as pl
from jax.experimental.pallas import tpu as pltpu

_LANES = 128


def _round_up(v, m):
    return ((v + m - 1) // m) * m


def student_forward(input_student, labels, weight, bias):
    """input_student: [B, H] f32, labels: [B] int, weight: [L, H] f32 (PyTorch
    layout), bias: [L] f32.  Returns (loss scalar, logits [B, L]) with
    torch CrossEntropyLoss(mean) semantics (bf16 matmul, f32 accumulation)."""
    B, H = input_student.shape
    L = weight.shape[0]
    H_pad = _round_up(H, _LANES)
    L_pad = _round_up(L, _LANES)

    # ---- wrapper-side layout / dtype prep (one-time, outside the grid) ----
    # x: bf16, zero-padded along H (contraction dim -> lanes).
    x_bf = input_student.astype(jnp.bfloat16)
    if H_pad != H:
        x_in = jnp.zeros((B, H_pad), jnp.bfloat16).at[:, :H].set(x_bf)
    else:
        x_in = x_bf

    # W: transposed once to [H_pad, L_pad] bf16 (zero rows/cols for padding).
    w_t = weight.T.astype(jnp.bfloat16)                       # [H, L]
    w_t_pad = jnp.zeros((H_pad, L_pad), jnp.bfloat16).at[:H, :L].set(w_t)

    # bias: f32, -1e30 on padded label columns so they vanish in max / exp.
    b_pad = jnp.full((1, L_pad), -1e30, dtype=jnp.float32).at[0, :L].set(bias)

    labels2 = labels.reshape(B, 1).astype(jnp.int32)

    # Batch tile: whole batch if it fits, otherwise 512 rows (mult. of 8/16).
    TB = B if B <= 512 else 512
    n_tiles = pl.cdiv(B, TB)
    needs_row_mask = (B % TB) != 0   # trace-time constant

    def kernel(x_ref, w_ref, b_ref, lab_ref, logits_ref, pel_ref):
        x = x_ref[...]                       # [TB, H_pad]  bf16
        w = w_ref[...]                       # [H_pad, L_pad] bf16
        b = b_ref[...]                       # [1, L_pad]   f32

        # logits = x @ W^T + b : bf16 operands, f32 MXU accumulation.
        logits = jax.lax.dot_general(
            x, w,
            dimension_numbers=(((1,), (0,)), ((), ())),
            preferred_element_type=jnp.float32) + b          # [TB, L_pad] f32
        logits_ref[...] = logits.astype(logits_ref.dtype)     # lane-dense vst

        # Numerically stable log-softmax, all in f32.  Padded columns sit at
        # ~-1e30 so they never win the max and exp() underflows to 0.
        m = jnp.max(logits, axis=-1, keepdims=True)            # [TB, 1]
        lse = jnp.log(jnp.sum(jnp.exp(logits - m), axis=-1, keepdims=True)) + m

        lab = lab_ref[...]                                      # [TB, 1] i32
        col = jax.lax.broadcasted_iota(jnp.int32, logits.shape, 1)
        picked = jnp.sum(jnp.where(col == lab, logits, 0.0),
                         axis=-1, keepdims=True)                # [TB, 1]

        per_example = lse - picked                              # [TB, 1]

        if needs_row_mask:
            # Only emitted when the last tile can be ragged: keep garbage rows
            # from propagating if this output is ever consumed pre-slice.
            i = pl.program_id(0)
            row = jax.lax.broadcasted_iota(jnp.int32, per_example.shape, 0) + i * TB
            per_example = jnp.where(row < B, per_example, 0.0)

        pel_ref[...] = per_example

    logits_pad, per_example = pl.pallas_call(
        kernel,
        out_shape=(
            jax.ShapeDtypeStruct((B, L_pad), jnp.float32),     # logits slab
            jax.ShapeDtypeStruct((B, 1), jnp.float32),         # per-example CE
        ),
        grid=(n_tiles,),
        in_specs=[
            pl.BlockSpec((TB, H_pad), lambda i: (i, 0)),       # x, batch-tiled
            pl.BlockSpec((H_pad, L_pad), lambda i: (0, 0)),    # W^T, resident
            pl.BlockSpec((1, L_pad), lambda i: (0, 0)),        # bias, resident
            pl.BlockSpec((TB, 1), lambda i: (i, 0)),           # labels, tiled
        ],
        out_specs=(
            pl.BlockSpec((TB, L_pad), lambda i: (i, 0)),
            pl.BlockSpec((TB, 1), lambda i: (i, 0)),
        ),
        compiler_params=pltpu.CompilerParams(
            dimension_semantics=("parallel",),                 # v7x: 2 TCs
            vmem_limit_bytes=48 * 1024 * 1024),                # v7x-safe budget
    )(x_in, w_t_pad, b_pad, labels2)

    loss = jnp.sum(per_example) * (1.0 / B)                    # mean reduction
    return loss, logits_pad[:, :L]


if __name__ == "__main__":
    # Small config consistent with the module: hidden_size=32, num_labels=4, batch=8.
    B, H, L = 8, 32, 4

    key = jax.random.PRNGKey(0)
    k_x, k_lab, k_w, k_b = jax.random.split(key, 4)

    input_student = jax.random.normal(k_x, (B, H), dtype=jnp.float32)
    labels = jax.random.randint(k_lab, (B,), 0, L, dtype=jnp.int32)

    # Deterministic parameter init (mimics nn.Linear uniform(-1/sqrt(H), 1/sqrt(H))).
    bound = 1.0 / (H ** 0.5)
    weight = jax.random.uniform(k_w, (L, H), dtype=jnp.float32,
                                minval=-bound, maxval=bound)
    bias = jax.random.uniform(k_b, (L,), dtype=jnp.float32,
                              minval=-bound, maxval=bound)

    loss, logits = student_forward(input_student, labels, weight, bias)
    jax.block_until_ready((loss, logits))

    # Reference 1: same bf16-operand / f32-accumulation path (tight tolerance).
    logits_ref_bf = jnp.dot(input_student.astype(jnp.bfloat16),
                            weight.astype(jnp.bfloat16).T,
                            preferred_element_type=jnp.float32) + bias
    lse_bf = jax.scipy.special.logsumexp(logits_ref_bf, axis=-1)
    loss_ref_bf = jnp.mean(lse_bf - logits_ref_bf[jnp.arange(B), labels])

    # Reference 2: full-f32 torch-equivalent semantics (relaxed tolerance for
    # the deliberate bf16 matmul operands).
    logits_ref_f32 = input_student @ weight.T + bias
    lse_f32 = jax.scipy.special.logsumexp(logits_ref_f32, axis=-1)
    loss_ref_f32 = jnp.mean(lse_f32 - logits_ref_f32[jnp.arange(B), labels])

    assert logits.shape == (B, L)
    assert jnp.allclose(logits, logits_ref_bf, atol=1e-4, rtol=1e-4)
    assert jnp.allclose(loss, loss_ref_bf, atol=1e-4, rtol=1e-4)
    assert jnp.allclose(logits, logits_ref_f32, atol=2e-2, rtol=2e-2)
    assert jnp.allclose(loss, loss_ref_f32, atol=2e-2, rtol=2e-2)

    print("KERNEL_OK")
</pallas_src>

<mosaic_0001>
module attributes {stable_mosaic.version = 11 : i64} {
  func.func @kernel(%arg0: i32, %arg1: memref<8x128xbf16, #tpu.memory_space<vmem>>, %arg2: memref<128x128xbf16, #tpu.memory_space<vmem>>, %arg3: memref<1x128xf32, #tpu.memory_space<vmem>>, %arg4: memref<8x1xi32, #tpu.memory_space<vmem>>, %arg5: memref<8x128xf32, #tpu.memory_space<vmem>>, %arg6: memref<8x1xf32, #tpu.memory_space<vmem>>) attributes {dimension_semantics = [#tpu.dimension_semantics<parallel>], iteration_bounds = array<i64: 1>, scalar_prefetch = 0 : i64, scratch_operands = 0 : i64, tpu.core_type = #tpu.core_type<tc>, window_params = [{transform_indices = @transform_0, window_bounds = array<i64: 8, 128>}, {pipeline_mode = #tpu.pipeline_mode<synchronous>, transform_indices = @transform_1, window_bounds = array<i64: 128, 128>}, {pipeline_mode = #tpu.pipeline_mode<synchronous>, transform_indices = @transform_2, window_bounds = array<i64: 1, 128>}, {transform_indices = @transform_3, window_bounds = array<i64: 8, 1>}, {transform_indices = @transform_4, window_bounds = array<i64: 8, 128>}, {transform_indices = @transform_5, window_bounds = array<i64: 8, 1>}]} {
    %c0 = arith.constant 0 : index
    %c0_0 = arith.constant 0 : index
    %0 = vector.load %arg1[%c0, %c0_0] : memref<8x128xbf16, #tpu.memory_space<vmem>>, vector<8x128xbf16>
    %c0_1 = arith.constant 0 : index
    %c0_2 = arith.constant 0 : index
    %1 = vector.load %arg2[%c0_1, %c0_2] : memref<128x128xbf16, #tpu.memory_space<vmem>>, vector<128x128xbf16>
    %c0_3 = arith.constant 0 : index
    %c0_4 = arith.constant 0 : index
    %2 = vector.load %arg3[%c0_3, %c0_4] : memref<1x128xf32, #tpu.memory_space<vmem>>, vector<1x128xf32>
    %cst = arith.constant dense<0.000000e+00> : vector<8x128xf32>
    %3 = tpu.matmul %0, %1, %cst {dimension_numbers = #tpu.dot_dimension_numbers<[1], [0], [0], [1], [0, 0, 1, 1], [], []>} : vector<8x128xbf16>, vector<128x128xbf16>, vector<8x128xf32> -> vector<8x128xf32>
    %4 = vector.broadcast %2 : vector<1x128xf32> to vector<8x128xf32>
    %5 = arith.addf %3, %4 : vector<8x128xf32>
    %c0_5 = arith.constant 0 : index
    %c0_6 = arith.constant 0 : index
    %6 = vector.load %arg5[%c0_5, %c0_6] : memref<8x128xf32, #tpu.memory_space<vmem>>, vector<8x128xf32>
    tpu.vector_store %arg5[%c0_5, %c0_6], %5 {strides = array<i32>} : memref<8x128xf32, #tpu.memory_space<vmem>>, vector<8x128xf32>,
    %cst_7 = arith.constant dense<0xFF800000> : vector<8xf32>
    %7 = vector.multi_reduction <maximumf>, %5, %cst_7 [1] : vector<8x128xf32> to vector<8xf32>
    %8 = vector.shape_cast %7 : vector<8xf32> to vector<8x1xf32>
    %9 = vector.broadcast %8 : vector<8x1xf32> to vector<8x128xf32>
    %10 = arith.subf %5, %9 : vector<8x128xf32>
    %11 = math.exp %10 : vector<8x128xf32>
    %cst_8 = arith.constant dense<0.000000e+00> : vector<8xf32>
    %12 = vector.multi_reduction <add>, %11, %cst_8 [1] : vector<8x128xf32> to vector<8xf32>
    %13 = vector.shape_cast %12 : vector<8xf32> to vector<8x1xf32>
    %14 = math.log %13 : vector<8x1xf32>
    %15 = arith.addf %14, %8 : vector<8x1xf32>
    %c0_9 = arith.constant 0 : index
    %c0_10 = arith.constant 0 : index
    %16 = vector.load %arg4[%c0_9, %c0_10] : memref<8x1xi32, #tpu.memory_space<vmem>>, vector<8x1xi32>
    %17 = tpu.iota {dimensions = array<i32: 1>} : vector<8x128xi32>
    %18 = vector.broadcast %16 : vector<8x1xi32> to vector<8x128xi32>
    %19 = arith.cmpi eq, %17, %18 : vector<8x128xi32>
    %cst_11 = arith.constant 0.000000e+00 : f32
    %20 = vector.broadcast %cst_11 : f32 to vector<8x128xf32>
    %21 = arith.select %19, %5, %20 : vector<8x128xi1>, vector<8x128xf32>
    %cst_12 = arith.constant dense<0.000000e+00> : vector<8xf32>
    %22 = vector.multi_reduction <add>, %21, %cst_12 [1] : vector<8x128xf32> to vector<8xf32>
    %23 = vector.shape_cast %22 : vector<8xf32> to vector<8x1xf32>
    %24 = arith.subf %15, %23 : vector<8x1xf32>
    %c0_13 = arith.constant 0 : index
    %c0_14 = arith.constant 0 : index
    %25 = vector.load %arg6[%c0_13, %c0_14] : memref<8x1xf32, #tpu.memory_space<vmem>>, vector<8x1xf32>
    tpu.vector_store %arg6[%c0_13, %c0_14], %24 {strides = array<i32>} : memref<8x1xf32, #tpu.memory_space<vmem>>, vector<8x1xf32>,
    return
  }
  func.func @transform_0(%arg0: i32) -> (i32, i32) {
    %c0_i32 = arith.constant 0 : i32
    %c0_i32_0 = arith.constant 0 : i32
    return %arg0, %c0_i32 : i32, i32
  }
  func.func @transform_1(%arg0: i32) -> (i32, i32) {
    %c0_i32 = arith.constant 0 : i32
    %c0_i32_0 = arith.constant 0 : i32
    %c0_i32_1 = arith.constant 0 : i32
    return %c0_i32, %c0_i32_0 : i32, i32
  }
  func.func @transform_2(%arg0: i32) -> (i32, i32) {
    %c0_i32 = arith.constant 0 : i32
    %c0_i32_0 = arith.constant 0 : i32
    %c0_i32_1 = arith.constant 0 : i32
    return %c0_i32, %c0_i32_0 : i32, i32
  }
  func.func @transform_3(%arg0: i32) -> (i32, i32) {
    %c0_i32 = arith.constant 0 : i32
    %c0_i32_0 = arith.constant 0 : i32
    return %arg0, %c0_i32 : i32, i32
  }
  func.func @transform_4(%arg0: i32) -> (i32, i32) {
    %c0_i32 = arith.constant 0 : i32
    %c0_i32_0 = arith.constant 0 : i32
    return %arg0, %c0_i32 : i32, i32
  }
  func.func @transform_5(%arg0: i32) -> (i32, i32) {
    %c0_i32 = arith.constant 0 : i32
    %c0_i32_0 = arith.constant 0 : i32
    return %arg0, %c0_i32 : i32, i32
  }
}

</mosaic_0001>

<bundles_post_ra>
// kernel: tpu_custom_call.1
= control target key start
LH: loop header
LB: loop body
LE: loop exit
PB: predicated region body
PF: predicated region fallthrough
CT: control target
= control target key end

     0   :  { %11 = vsyncpa [#allocation3], 0  ;;  %s369_s0 = inlined_call_operand.vmem [shape: bf16[8,128], index: 0, kind: input, shape index: {}]   ;;  %s370_s1 = inlined_call_operand.hbm [shape: bf16[128,128], index: 1, kind: input, shape index: {}]   ;;  %s371_s2 = inlined_call_operand.vmem [shape: f32[1,128], index: 2, kind: input, shape index: {}]   ;;  %s372_s3 = inlined_call_operand.vmem [shape: s32[8,1], index: 3, kind: input, shape index: {}]   ;;  %s373_s4 = inlined_call_operand.hbm [shape: f32[8,128], index: 4, kind: output, shape index: {0}]   ;;  %s374_s5 = inlined_call_operand.vmem [shape: f32[8,1], index: 5, kind: output, shape index: {1}]  }
   0x1   :  { %12 = vsyncpa [#allocation4], 0  ;;  %s296_s18 = smov [#allocation2]   ;;  %s248_s22 = scalar_lea.hbm %s370_s1, 1024 }
   0x2   :  { %s20_s19 = sshll.u32 %s296_s18, 4  ;;  %p249_p0 = scmp.ne.s32.totalorder %s370_s1, %s248_s22  ;;  %s21_s19 = int_to_ptr.vmem [resolvable:$true] %s20_s19 }
   0x3   :  { %p252_p1 = scmp.lt.u32.totalorder %s248_s22, %s370_s1 }
   0x5   :  { %p254_p2 = pnand %p252_p1, %p249_p0 }
   0x7   :  { %257 = shalt.err (!%p254_p2)
}
   0x8   :  { %s258_s27 = scalar_lea.vmem %s21_s19, 1024  ;;  %p263_p4 = scmp.lt.s32.totalorder %s21_s19, %s21_s19 }
   0x9   :  { %p259_p3 = scmp.ne.s32.totalorder %s21_s19, %s258_s27  ;;  %p264_p5 = scmp.lt.s32.totalorder %s258_s27, %s258_s27 }
   0xb   :  { %p265_p6 = por %p264_p5, %p263_p4 }
   0xd   :  { %p266_p7 = pnand %p265_p6, %p259_p3 }
   0xf   :  { %269 = shalt.err (!%p266_p7)
}
  0x10   :  { %s297_s28 = smov 64   ;;  %s298_s29 = smov 4  }
  0x11   :  { %26 = dma.hbm_to_vmem [thread:$0]  %s370_s1, 1024, %s21_s19, [#allocation3], %s297_s28, %s297_s28, %s298_s29  }
  0x12   :  { %292 = dma.done.wait [#allocation3], 1024  }
  0x13   :  { %293 = vsyncadd [#allocation3], 4294966272  ;;  %v299_v0 = vmov 0.0   ;;  %vm300_vm0 = vmmov 0   ;;  %v236_v1 = vld [vmem:[#allocation2] sm:$0xff]   ;;  %v237_v2 = vld [vmem:[#allocation2 + $0x8] sm:$0xff]   ;;  %v159_v21 = vlaneseq }
  0x14   :  { %208 = vmatprep.subr.bf16.mxu0 %v299_v0  ;;  %224 = vmatprep.mubr.msk.bf16.mxu0 %vm300_vm0, %v299_v0  ;;  %v238_v3 = vld [vmem:[#allocation2 + $0x10] sm:$0xff]   ;;  %v239_v4 = vld [vmem:[#allocation2 + $0x18] sm:$0xff]   ;;  %v240_v5 = vld [vmem:[#allocation2 + $0x20] sm:$0xff]   ;;  %v301_v10 = vmov 0  }
  0x15   :  { %209 = vmatpush3.bf16.msra.mxu0 %v236_v1  ;;  %v241_v6 = vld [vmem:[#allocation2 + $0x28] sm:$0xff]   ;;  %v242_v7 = vld [vmem:[#allocation2 + $0x30] sm:$0xff]   ;;  %v243_v8 = vld [vmem:[#allocation2 + $0x38] sm:$0xff]   ;;  %235 = vset.pattern.permute.xlu0 %v301_v10  ;;  %v160_v22 = vand.u32 127, %v159_v21 }
  0x16   :  { %210 = vmatprep.subr.bf16.mxu0 %v299_v0  ;;  %v35_v9 = vld [vmem:[%s369_s0] sm:$0xf]  ;;  %s302_s0 = smov [#allocation5]  }
  0x17   :  { %v190_v11 = vld [vmem:[%s371_s2] ss:$0 sm:$0xff]  ;;  %s177_s2 = sshll.u32 %s302_s0, 4  ;;  %s178_s2 = int_to_ptr.vmem [resolvable:$true] %s177_s2 }
  0x18   :  { %v158_v17 = vld [vmem:[%s372_s3] sm:$0xff]  ;;  %s270_s12 = scalar_lea.vmem %s178_s2, 128  ;;  %p275_p9 = scmp.lt.s32.totalorder %s178_s2, %s178_s2 }
  0x19   :  { %211 = vmatpush3.bf16.msra.mxu0 %v237_v2  ;;  %p271_p8 = scmp.ne.s32.totalorder %s178_s2, %s270_s12  ;;  %p276_p10 = scmp.lt.s32.totalorder %s270_s12, %s270_s12 }
  0x1a   :  { %212 = vmatprep.subr.bf16.mxu0 %v299_v0 }
  0x1b   :  { %p277_p11 = por %p276_p10, %p275_p9 }
  0x1d   :  { %213 = vmatpush3.bf16.msra.mxu0 %v238_v3  ;;  %p278_p12 = pnand %p277_p11, %p271_p8 }
  0x1e   :  { %214 = vmatprep.subr.bf16.mxu0 %v299_v0 }
  0x21   :  { %215 = vmatpush3.bf16.msra.mxu0 %v239_v4 }
  0x22   :  { %216 = vmatprep.subr.bf16.mxu0 %v299_v0 }
  0x25   :  { %217 = vmatpush3.bf16.msra.mxu0 %v240_v5 }
  0x26   :  { %218 = vmatprep.subr.bf16.mxu0 %v299_v0 }
  0x29   :  { %219 = vmatpush3.bf16.msra.mxu0 %v241_v6 }
  0x2a   :  { %220 = vmatprep.subr.bf16.mxu0 %v299_v0 }
  0x2d   :  { %221 = vmatpush3.bf16.msra.mxu0 %v242_v7 }
  0x2e   :  { %222 = vmatprep.subr.bf16.mxu0 %v299_v0 }
  0x31   :  { %223 = vmatpush3.bf16.msra.mxu0 %v243_v8 }
  0x34   :  { %225 = vmatmul.mubr.bf16.vlgmr.msra.gmra.mrb[0].mxu0 %v35_v9 }
 0x107   :  { %v141_v12 = vpop.f32.mrb[0].mxu0 }
 0x108   :  { %v142_v13 = vadd.f32 %v190_v11, %v141_v12  ;;  %v226_v14 = vpop.f32.mrb[1].mxu0 }
 0x109   :  { %v144_v15 = vpop.f32.mrb[2].mxu0 }
 0x10a   :  { %147 = vst [vmem:[#allocation5] sm:$0xff] %v142_v13  ;;  %148 = vmax.xlane.f32.xlu0 %v142_v13  ;;  %v227_v16 = vpop.f32.mrb[3].mxu0 }
 0x120   :  { %162 = vperm.xlu0 %235, %v158_v17  }
 0x197   :  { %v149_v18 = vpop.xlane.xlu0 %148 }
 0x198   :  { %v150_v19 = vsub.f32 %v142_v13, %v149_v18 }
 0x19a   :  { %v151_v20 = vmul.f32 1.442695, %v150_v19 }
 0x19c   :  { %244 = vpow2.f32 %v151_v20 }
 0x19f   :  { %v163_v23 = vpop.permute.xlu0 %162 }
 0x1a0   :  { %vm164_vm1 = vcmp.eq.s32.totalorder %v160_v22, %v163_v23 }
 0x1a1   :  { %v165_v25 = vsel %vm164_vm1, %v142_v13, 0.0 }
 0x1a6   :  { %v245_v24 = vpop.eup %244 }
 0x1a7   :  { %153 = vadd.xlane.f32.xlu1 %v245_v24 }
 0x1ab   :  { %166 = vadd.xlane.f32.xlu1 %v165_v25 }
 0x1ac   :  { %281 = shalt.err (!%p278_p12)
}
 0x1ad   :  { %s282_s14 = scalar_lea.hbm %s373_s4, 128 }
 0x1ae   :  { %p283_p13 = scmp.ne.s32.totalorder %s373_s4, %s282_s14  ;;  %p286_p0 = scmp.lt.u32.totalorder %s282_s14, %s373_s4 }
 0x1b0   :  { %p288_p1 = pnand %p286_p0, %p283_p13 }
 0x1b2   :  { %291 = shalt.err (!%p288_p1)
}
 0x1b3   :  { %180 = dma.vmem_to_hbm [thread:$0]  %s178_s2, 128, %s373_s4, [#allocation4]   ;;  %vm169_vm2 = vcmask 7168  }
 0x234   :  { %v154_v26 = vpop.xlane.xlu1 %153 }
 0x235   :  { %246 = vlog2.f32 %v154_v26 }
 0x238   :  { %v167_v30 = vpop.xlane.xlu1 %166 }
 0x23f   :  { %v247_v27 = vpop.eup %246 }
 0x240   :  { %v156_v28 = vmul.f32 0.6931472, %v247_v27 }
 0x242   :  { %v157_v29 = vadd.f32 %v156_v28, %v149_v18 }
 0x244   :  { %v168_v31 = vsub.f32 %v157_v29, %v167_v30 }
 0x246   :  { %170 = vst.msk [vmem:[%s374_s5] sm:$0xff] %vm169_vm2, %v168_v31 }
 0x247   :  { %294 = dma.done.wait [#allocation4], 128  }
 0x248   :  { %295 = vsyncadd [#allocation4], 4294967168 }
 0x249   :  { %188 = vsyncpa [#allocation3], 1 }
 0x24a   :  { %189 = vsyncpa [#allocation4], 1 }

</bundles_post_ra>
